<compile_context>
chip_gen: v7x
topology: tpu7x:2x2x1
jax: 0.10.0
libtpu: 0.0.40
codegen_flags: <defaults>
</compile_context>

<pallas_src>
import jax
import jax.numpy as jnp
from jax.experimental import pallas as pl
from jax.experimental.pallas import tpu as pltpu


_LANE = 128
_SUBLANE = 8


def _round_up(x, m):
    return ((x + m - 1) // m) * m


def _pad_axis(x, axis, new_size):
    pad = new_size - x.shape[axis]
    if pad == 0:
        return x
    widths = [(0, 0)] * x.ndim
    widths[axis] = (0, pad)
    return jnp.pad(x, widths)


def _vmem_budget_bytes():
    """Generation-aware scoped-VMEM budget (~75% of physical VMEM)."""
    try:
        phys = int(pltpu.get_tpu_info().vmem_capacity_bytes)
    except Exception:
        phys = 64 * 1024 * 1024   # conservative (v7x-sized) fallback
    return max(32 * 1024 * 1024, (phys * 3) // 4)


def _pick_batch_tile(B):
    # 128 matches the MXU on all generations; smaller B keeps a single partial tile.
    return 128 if B >= 128 else _round_up(B, _SUBLANE)


# --------------------------- fused kernel (avgpool path) --------------------------- #

def _make_fused_kernel(n_tokens, tn, mm_dtype):
    """ref order: patch, cls_cat, w_pool, w_cls, bias, out, sum_scratch
       grid     : (batch tiles [parallel], token tiles [arbitrary/reduction])"""
    inv_n = 1.0 / float(n_tokens)
    needs_mask = (n_tokens % tn) != 0   # only the ragged last token tile needs masking

    def kernel(patch_ref, cls_ref, w_pool_ref, w_cls_ref, b_ref, o_ref, sum_ref):
        k = pl.program_id(1)

        @pl.when(k == 0)
        def _():
            sum_ref[...] = jnp.zeros_like(sum_ref)

        # Pure stream+reduce inner loop: accumulate the token SUM in f32.
        x = patch_ref[...].astype(jnp.float32)                    # (TB, TN, D)
        if needs_mask:
            tok = jax.lax.broadcasted_iota(jnp.int32, x.shape[1:], 0) + k * tn  # (TN, D)
            x = jnp.where((tok < n_tokens)[None], x, 0.0)
        sum_ref[...] += jnp.sum(x, axis=1)                         # (TB, D)

        @pl.when(k == pl.num_programs(1) - 1)
        def _():
            # mean = sum * (1/N), scaled exactly once; single pool matmul + single
            # cls matmul + bias, all at finalize (weights touched once per batch tile).
            pooled = (sum_ref[...] * inv_n).astype(mm_dtype)
            logits = jnp.dot(pooled, w_pool_ref[...],
                             preferred_element_type=jnp.float32)
            logits = logits + jnp.dot(cls_ref[...].astype(mm_dtype), w_cls_ref[...],
                                      preferred_element_type=jnp.float32)
            o_ref[...] = logits + b_ref[...]

    return kernel


def fused_linear_probe(patch_tokens, cls_cat, w_cls, w_pool, bias_p, num_classes):
    """logits = cls_cat @ w_cls + mean(patch_tokens, 1) @ w_pool + b  (padded classes)."""
    B, N, D = patch_tokens.shape
    nbD = cls_cat.shape[-1]
    Cp = bias_p.shape[-1]
    wbytes = jnp.dtype(w_cls.dtype).itemsize

    budget = _vmem_budget_bytes()
    tile_budget = int(budget * 0.85)
    TB = _pick_batch_tile(B)

    # Residency model (conservatively assume constant-index inputs are double-buffered).
    resident = (2 * ((nbD * Cp + D * Cp) * wbytes + Cp * 4
                     + TB * nbD * 4 + TB * Cp * 4)
                + TB * D * 4)
    tn_cap = 1024 if budget >= (80 << 20) else 512
    TN = min(_round_up(N, _SUBLANE), tn_cap)
    while TN > _SUBLANE and resident + 2 * TB * TN * D * 4 > tile_budget:
        TN = max(_SUBLANE, _round_up(TN // 2, _SUBLANE))
    # TODO(synk): if TN still bottoms out at 8 (extreme D*Cp), tile the class dim /
    # split into a streaming-sum call + tiny GEMM call instead of shipping 8-token tiles.

    grid = (pl.cdiv(B, TB), pl.cdiv(N, TN))

    out = pl.pallas_call(
        _make_fused_kernel(N, TN, w_cls.dtype),
        out_shape=jax.ShapeDtypeStruct((B, Cp), jnp.float32),
        grid_spec=pltpu.PrefetchScalarGridSpec(
            num_scalar_prefetch=0,
            grid=grid,
            in_specs=[
                pl.BlockSpec((TB, TN, D), lambda b, k: (b, k, 0)),   # streamed
                pl.BlockSpec((TB, nbD), lambda b, k: (b, 0)),        # per-batch-tile
                pl.BlockSpec((D, Cp), lambda b, k: (0, 0)),          # resident
                pl.BlockSpec((nbD, Cp), lambda b, k: (0, 0)),        # resident
                pl.BlockSpec((1, Cp), lambda b, k: (0, 0)),          # resident
            ],
            out_specs=pl.BlockSpec((TB, Cp), lambda b, k: (b, 0)),
            scratch_shapes=[pltpu.VMEM((TB, D), jnp.float32)],
        ),
        compiler_params=pltpu.CompilerParams(
            dimension_semantics=("parallel", "arbitrary"),
            vmem_limit_bytes=budget,
        ),
    )(patch_tokens, cls_cat, w_pool, w_cls, bias_p)

    return out[:, :num_classes]


# --------------------------- class-tokens-only kernel (no avgpool) ------------------ #

def _make_cls_kernel(mm_dtype):
    def kernel(cls_ref, w_ref, b_ref, o_ref):
        o_ref[...] = (jnp.dot(cls_ref[...].astype(mm_dtype), w_ref[...],
                              preferred_element_type=jnp.float32) + b_ref[...])
    return kernel


def cls_linear_probe(cls_cat, w_cls, bias_p, num_classes):
    B, nbD = cls_cat.shape
    Cp = bias_p.shape[-1]
    budget = _vmem_budget_bytes()
    TB = _pick_batch_tile(B)

    out = pl.pallas_call(
        _make_cls_kernel(w_cls.dtype),
        out_shape=jax.ShapeDtypeStruct((B, Cp), jnp.float32),
        grid_spec=pltpu.PrefetchScalarGridSpec(
            num_scalar_prefetch=0,
            grid=(pl.cdiv(B, TB),),
            in_specs=[
                pl.BlockSpec((TB, nbD), lambda b: (b, 0)),
                pl.BlockSpec((nbD, Cp), lambda b: (0, 0)),   # resident
                pl.BlockSpec((1, Cp), lambda b: (0, 0)),     # resident
            ],
            out_specs=pl.BlockSpec((TB, Cp), lambda b: (b, 0)),
        ),
        compiler_params=pltpu.CompilerParams(
            dimension_semantics=("parallel",),
            vmem_limit_bytes=budget,
        ),
    )(cls_cat, w_cls, bias_p)

    return out[:, :num_classes]


# ----------------------------------- Module port ------------------------------------ #

class LinearClassifier:
    """Linear layer on top of frozen DINOv2 features — fused Pallas forward."""

    def __init__(self, out_dim, use_n_blocks, use_avgpool, num_classes=1000, key=None,
                 param_dtype=None):
        self.out_dim = out_dim
        self.use_n_blocks = use_n_blocks
        self.use_avgpool = use_avgpool
        self.num_classes = num_classes
        if key is None:
            key = jax.random.PRNGKey(0)
        # Matches PyTorch init: weight ~ N(0, 0.01), bias = 0.
        self.weight = jax.random.normal(key, (num_classes, out_dim), jnp.float32) * 0.01
        self.bias = jnp.zeros((num_classes,), jnp.float32)

        n_chunks = use_n_blocks + (1 if use_avgpool else 0)
        assert out_dim % n_chunks == 0, "out_dim must equal embed_dim * (use_n_blocks [+1])"
        self.embed_dim = out_dim // n_chunks
        Cp = _round_up(num_classes, _LANE)

        # Auto-pick VMEM weight precision: if resident f32 weights (x2 for possible
        # double-buffering) would eat more than ~25% of the VMEM budget, hold the
        # VMEM weight copies in bf16 and feed the MXU bf16 with f32 accumulation.
        if param_dtype is None:
            budget = _vmem_budget_bytes()
            param_dtype = (jnp.bfloat16
                           if 2 * out_dim * Cp * 4 > budget // 2 else jnp.float32)
        self._w_dtype = jnp.dtype(param_dtype)

        # One-time parameter prep (NOT per call): transpose, class-dim pad to a
        # multiple of 128 (zero columns, sliced off after the kernel -> lane-dense
        # output stores), split into one cls-weight block and one pool-weight block.
        w_t = _pad_axis(self.weight.T, 1, Cp)               # (out_dim, Cp), f32
        nbD = self.embed_dim * use_n_blocks
        self._w_cls = w_t[:nbD].astype(self._w_dtype)        # (nb*D, Cp)
        self._w_pool = (w_t[nbD:].astype(self._w_dtype)      # (D, Cp)
                        if use_avgpool else None)
        self._bias = _pad_axis(self.bias.reshape(1, -1), 1, Cp)   # (1, Cp), f32

    def __call__(self, x_tokens_list):
        blocks = x_tokens_list[-self.use_n_blocks:]
        # Tiny (B, nb*D) concat in the wrapper -> one cls matmul in-kernel.
        cls_cat = jnp.concatenate([ct for _, ct in blocks], axis=-1).astype(jnp.float32)
        if self.use_avgpool:
            patch_tokens = blocks[-1][0]
            return fused_linear_probe(patch_tokens, cls_cat, self._w_cls, self._w_pool,
                                      self._bias, self.num_classes)
        return cls_linear_probe(cls_cat, self._w_cls, self._bias, self.num_classes)


# --------------------------------------- Demo --------------------------------------- #

if __name__ == "__main__":
    key = jax.random.PRNGKey(0)

    B, N, D = 2, 8, 32
    n_blocks_total = 3
    use_n_blocks = 2
    num_classes = 100   # deliberately not a multiple of 128 -> exercises padding/slicing

    keys = jax.random.split(key, 2 * n_blocks_total + 2)
    x_tokens_list = []
    for i in range(n_blocks_total):
        patch_tokens = jax.random.normal(keys[2 * i], (B, N, D), dtype=jnp.float32)
        class_token = jax.random.normal(keys[2 * i + 1], (B, D), dtype=jnp.float32)
        x_tokens_list.append((patch_tokens, class_token))

    # --- use_avgpool=True path (fused pool + concat + linear) ---
    out_dim_a = D * (use_n_blocks + 1)
    clf_a = LinearClassifier(out_dim_a, use_n_blocks, True, num_classes, key=keys[-2])
    logits_a = clf_a(x_tokens_list)
    jax.block_until_ready(logits_a)

    feats_a = jnp.concatenate([ct for _, ct in x_tokens_list[-use_n_blocks:]], axis=-1)
    feats_a = jnp.concatenate(
        (feats_a, jnp.mean(x_tokens_list[-1][0], axis=1)), axis=-1).astype(jnp.float32)
    ref_a = feats_a @ clf_a.weight.T + clf_a.bias
    assert logits_a.shape == (B, num_classes)
    assert jnp.allclose(logits_a, ref_a, atol=2e-5, rtol=2e-5)

    # --- use_avgpool=False path (class tokens only) ---
    out_dim_b = D * use_n_blocks
    clf_b = LinearClassifier(out_dim_b, use_n_blocks, False, num_classes, key=keys[-1])
    logits_b = clf_b(x_tokens_list)
    jax.block_until_ready(logits_b)

    feats_b = jnp.concatenate(
        [ct for _, ct in x_tokens_list[-use_n_blocks:]], axis=-1).astype(jnp.float32)
    ref_b = feats_b @ clf_b.weight.T + clf_b.bias
    assert logits_b.shape == (B, num_classes)
    assert jnp.allclose(logits_b, ref_b, atol=2e-5, rtol=2e-5)

    print("KERNEL_OK")
</pallas_src>

<mosaic_0001>
module attributes {stable_mosaic.version = 11 : i64} {
  func.func @kernel(%arg0: i32, %arg1: i32, %arg2: memref<8x8x32xf32, #tpu.memory_space<vmem>>, %arg3: memref<8x64xf32, #tpu.memory_space<vmem>>, %arg4: memref<32x128xf32, #tpu.memory_space<vmem>>, %arg5: memref<64x128xf32, #tpu.memory_space<vmem>>, %arg6: memref<1x128xf32, #tpu.memory_space<vmem>>, %arg7: memref<8x128xf32, #tpu.memory_space<vmem>>, %arg8: memref<8x32xf32, #tpu.memory_space<vmem>>) attributes {dimension_semantics = [#tpu.dimension_semantics<parallel>, #tpu.dimension_semantics<arbitrary>], iteration_bounds = array<i64: 1, 1>, scalar_prefetch = 0 : i64, scratch_operands = 1 : i64, tpu.core_type = #tpu.core_type<tc>, window_params = [{transform_indices = @transform_0, window_bounds = array<i64: 8, 8, 32>}, {transform_indices = @transform_1, window_bounds = array<i64: 8, 64>}, {pipeline_mode = #tpu.pipeline_mode<synchronous>, transform_indices = @transform_2, window_bounds = array<i64: 32, 128>}, {pipeline_mode = #tpu.pipeline_mode<synchronous>, transform_indices = @transform_3, window_bounds = array<i64: 64, 128>}, {pipeline_mode = #tpu.pipeline_mode<synchronous>, transform_indices = @transform_4, window_bounds = array<i64: 1, 128>}, {transform_indices = @transform_5, window_bounds = array<i64: 8, 128>}]} {
    %c0_i32 = arith.constant 0 : i32
    %0 = arith.cmpi eq, %arg1, %c0_i32 : i32
    %1 = arith.extui %0 : i1 to i32
    %c0_i32_0 = arith.constant 0 : i32
    %2 = arith.cmpi ne, %1, %c0_i32_0 : i32
    scf.if %2 {
      %cst_9 = arith.constant 0.000000e+00 : f32
      %11 = vector.broadcast %cst_9 : f32 to vector<8x32xf32>
      %c0_10 = arith.constant 0 : index
      %c0_11 = arith.constant 0 : index
      %12 = vector.load %arg8[%c0_10, %c0_11] : memref<8x32xf32, #tpu.memory_space<vmem>>, vector<8x32xf32>
      tpu.vector_store %arg8[%c0_10, %c0_11], %11 {strides = array<i32>} : memref<8x32xf32, #tpu.memory_space<vmem>>, vector<8x32xf32>,
    } else {
    }
    %c0 = arith.constant 0 : index
    %c0_1 = arith.constant 0 : index
    %c0_2 = arith.constant 0 : index
    %3 = vector.load %arg2[%c0, %c0_1, %c0_2] : memref<8x8x32xf32, #tpu.memory_space<vmem>>, vector<8x8x32xf32>
    %c0_3 = arith.constant 0 : index
    %c0_4 = arith.constant 0 : index
    %4 = vector.load %arg8[%c0_3, %c0_4] : memref<8x32xf32, #tpu.memory_space<vmem>>, vector<8x32xf32>
    %cst = arith.constant dense<0.000000e+00> : vector<8x32xf32>
    %5 = vector.multi_reduction <add>, %3, %cst [1] : vector<8x8x32xf32> to vector<8x32xf32>
    %6 = arith.addf %4, %5 : vector<8x32xf32>
    %c0_5 = arith.constant 0 : index
    %c0_6 = arith.constant 0 : index
    %7 = vector.load %arg8[%c0_5, %c0_6] : memref<8x32xf32, #tpu.memory_space<vmem>>, vector<8x32xf32>
    tpu.vector_store %arg8[%c0_5, %c0_6], %6 {strides = array<i32>} : memref<8x32xf32, #tpu.memory_space<vmem>>, vector<8x32xf32>,
    %c0_i32_7 = arith.constant 0 : i32
    %8 = arith.cmpi eq, %arg1, %c0_i32_7 : i32
    %9 = arith.extui %8 : i1 to i32
    %c0_i32_8 = arith.constant 0 : i32
    %10 = arith.cmpi ne, %9, %c0_i32_8 : i32
    scf.if %10 {
      %c0_9 = arith.constant 0 : index
      %c0_10 = arith.constant 0 : index
      %11 = vector.load %arg8[%c0_9, %c0_10] : memref<8x32xf32, #tpu.memory_space<vmem>>, vector<8x32xf32>
      %cst_11 = arith.constant 1.250000e-01 : f32
      %12 = vector.broadcast %cst_11 : f32 to vector<8x32xf32>
      %13 = arith.mulf %11, %12 : vector<8x32xf32>
      %c0_12 = arith.constant 0 : index
      %c0_13 = arith.constant 0 : index
      %14 = vector.load %arg4[%c0_12, %c0_13] : memref<32x128xf32, #tpu.memory_space<vmem>>, vector<32x128xf32>
      %cst_14 = arith.constant dense<0.000000e+00> : vector<8x128xf32>
      %15 = tpu.matmul %13, %14, %cst_14 {dimension_numbers = #tpu.dot_dimension_numbers<[1], [0], [0], [1], [0, 0, 1, 1], [], []>} : vector<8x32xf32>, vector<32x128xf32>, vector<8x128xf32> -> vector<8x128xf32>
      %c0_15 = arith.constant 0 : index
      %c0_16 = arith.constant 0 : index
      %16 = vector.load %arg3[%c0_15, %c0_16] : memref<8x64xf32, #tpu.memory_space<vmem>>, vector<8x64xf32>
      %c0_17 = arith.constant 0 : index
      %c0_18 = arith.constant 0 : index
      %17 = vector.load %arg5[%c0_17, %c0_18] : memref<64x128xf32, #tpu.memory_space<vmem>>, vector<64x128xf32>
      %cst_19 = arith.constant dense<0.000000e+00> : vector<8x128xf32>
      %18 = tpu.matmul %16, %17, %cst_19 {dimension_numbers = #tpu.dot_dimension_numbers<[1], [0], [0], [1], [0, 0, 1, 1], [], []>} : vector<8x64xf32>, vector<64x128xf32>, vector<8x128xf32> -> vector<8x128xf32>
      %19 = arith.addf %15, %18 : vector<8x128xf32>
      %c0_20 = arith.constant 0 : index
      %c0_21 = arith.constant 0 : index
      %20 = vector.load %arg6[%c0_20, %c0_21] : memref<1x128xf32, #tpu.memory_space<vmem>>, vector<1x128xf32>
      %21 = vector.broadcast %20 : vector<1x128xf32> to vector<8x128xf32>
      %22 = arith.addf %19, %21 : vector<8x128xf32>
      %c0_22 = arith.constant 0 : index
      %c0_23 = arith.constant 0 : index
      %23 = vector.load %arg7[%c0_22, %c0_23] : memref<8x128xf32, #tpu.memory_space<vmem>>, vector<8x128xf32>
      tpu.vector_store %arg7[%c0_22, %c0_23], %22 {strides = array<i32>} : memref<8x128xf32, #tpu.memory_space<vmem>>, vector<8x128xf32>,
    } else {
    }
    return
  }
  func.func @transform_0(%arg0: i32, %arg1: i32) -> (i32, i32, i32) {
    %c0_i32 = arith.constant 0 : i32
    %c0_i32_0 = arith.constant 0 : i32
    return %arg0, %arg1, %c0_i32 : i32, i32, i32
  }
  func.func @transform_1(%arg0: i32, %arg1: i32) -> (i32, i32) {
    %c0_i32 = arith.constant 0 : i32
    %c0_i32_0 = arith.constant 0 : i32
    return %arg0, %c0_i32 : i32, i32
  }
  func.func @transform_2(%arg0: i32, %arg1: i32) -> (i32, i32) {
    %c0_i32 = arith.constant 0 : i32
    %c0_i32_0 = arith.constant 0 : i32
    %c0_i32_1 = arith.constant 0 : i32
    return %c0_i32, %c0_i32_0 : i32, i32
  }
  func.func @transform_3(%arg0: i32, %arg1: i32) -> (i32, i32) {
    %c0_i32 = arith.constant 0 : i32
    %c0_i32_0 = arith.constant 0 : i32
    %c0_i32_1 = arith.constant 0 : i32
    return %c0_i32, %c0_i32_0 : i32, i32
  }
  func.func @transform_4(%arg0: i32, %arg1: i32) -> (i32, i32) {
    %c0_i32 = arith.constant 0 : i32
    %c0_i32_0 = arith.constant 0 : i32
    %c0_i32_1 = arith.constant 0 : i32
    return %c0_i32, %c0_i32_0 : i32, i32
  }
  func.func @transform_5(%arg0: i32, %arg1: i32) -> (i32, i32) {
    %c0_i32 = arith.constant 0 : i32
    %c0_i32_0 = arith.constant 0 : i32
    return %arg0, %c0_i32 : i32, i32
  }
}

</mosaic_0001>

<bundles_post_ra>
// kernel: tpu_custom_call.1
= control target key start
LH: loop header
LB: loop body
LE: loop exit
PB: predicated region body
PF: predicated region fallthrough
CT: control target
= control target key end

     0   :  { %10 = vsyncpa [#allocation4], 0  ;;  %s659_s0 = inlined_call_operand.hbm [shape: f32[2,8,32], index: 0, kind: input, shape index: {}]   ;;  %s660_s1 = inlined_call_operand.vmem [shape: f32[2,64], index: 1, kind: input, shape index: {}]   ;;  %s661_s2 = inlined_call_operand.hbm [shape: f32[32,128], index: 2, kind: input, shape index: {}]   ;;  %s662_s3 = inlined_call_operand.hbm [shape: f32[64,128], index: 3, kind: input, shape index: {}]   ;;  %s663_s4 = inlined_call_operand.vmem [shape: f32[1,128], index: 4, kind: input, shape index: {}]   ;;  %s664_s5 = inlined_call_operand.hbm [shape: f32[2,128], index: 5, kind: output, shape index: {}]  }
   0x1   :  { %11 = vsyncpa [#allocation7], 0 }
   0x2   :  { %12 = vsyncpa [#allocation5], 0 }
   0x3   :  { %17 = vsyncadd [#allocation4], 768  ;;  %s521_s18 = smov [#allocation6]   ;;  %s522_s20 = smov [#allocation3]  }
   0x4   :  { %s32_s19 = sshll.u32 %s521_s18, 4  ;;  %s18_s21 = sshll.u32 %s522_s20, 4  ;;  %s33_s19 = int_to_ptr.vmem [resolvable:$true] %s32_s19  ;;  %s562_s21 = int_to_ptr.vmem [resolvable:$true] %s18_s21 }
   0x5   :  { %s427_s24 = scalar_lea.hbm %s661_s2, 512 }
   0x6   :  { %p428_p0 = scmp.ne.s32.totalorder %s661_s2, %s427_s24  ;;  %p431_p1 = scmp.lt.u32.totalorder %s427_s24, %s661_s2 }
   0x8   :  { %p433_p2 = pnand %p431_p1, %p428_p0 }
   0xa   :  { %436 = shalt.err (!%p433_p2)
}
   0xb   :  { %s437_s29 = scalar_lea.vmem %s33_s19, 512  ;;  %p442_p4 = scmp.lt.s32.totalorder %s33_s19, %s33_s19 }
   0xc   :  { %p438_p3 = scmp.ne.s32.totalorder %s33_s19, %s437_s29  ;;  %p443_p5 = scmp.lt.s32.totalorder %s437_s29, %s437_s29 }
   0xe   :  { %p444_p6 = por %p443_p5, %p442_p4 }
  0x10   :  { %p445_p7 = pnand %p444_p6, %p438_p3 }
  0x12   :  { %448 = shalt.err (!%p445_p7)
}
  0x13   :  { %s523_s30 = smov 128   ;;  %s524_s6 = smov 8  }
  0x14   :  { %38 = dma.hbm_to_vmem [thread:$0]  %s661_s2, 512, %s33_s19, [#allocation7], %s523_s30, %s523_s30, %s524_s6  }
  0x15   :  { %s449_s11 = scalar_lea.hbm %s659_s0, 256 }
  0x16   :  { %p450_p8 = scmp.ne.s32.totalorder %s659_s0, %s449_s11  ;;  %p453_p9 = scmp.lt.u32.totalorder %s449_s11, %s659_s0 }
  0x18   :  { %p455_p10 = pnand %p453_p9, %p450_p8 }
  0x1a   :  { %458 = shalt.err (!%p455_p10)
}
  0x1b   :  { %s459_s16 = scalar_lea.vmem %s562_s21, 256  ;;  %s463_s2 = scalar_lea.vmem %s562_s21, 1024 }
  0x1c   :  { %p460_p11 = scmp.ne.s32.totalorder %s562_s21, %s459_s16  ;;  %p464_p12 = scmp.lt.s32.totalorder %s562_s21, %s562_s21 }
  0x1d   :  { %p465_p13 = scmp.lt.s32.totalorder %s463_s2, %s459_s16 }
  0x1f   :  { %p466_p0 = por %p465_p13, %p464_p12 }
  0x21   :  { %p467_p1 = pnand %p466_p0, %p460_p11 }
  0x23   :  { %470 = shalt.err (!%p467_p1)
}
  0x24   :  { %24 = dma.hbm_to_vmem [thread:$0]  %s659_s0, 256, %s562_s21, [#allocation4], %s523_s30, %s523_s30, %s524_s6  }
  0x25   :  { %s525_s19 = smov [#allocation8]   ;;  %s471_s24 = scalar_lea.hbm %s662_s3, 1024 }
  0x26   :  { %s44_s20 = sshll.u32 %s525_s19, 4  ;;  %p472_p2 = scmp.ne.s32.totalorder %s662_s3, %s471_s24  ;;  %s45_s20 = int_to_ptr.vmem [resolvable:$true] %s44_s20 }
  0x27   :  { %p475_p3 = scmp.lt.u32.totalorder %s471_s24, %s662_s3 }
  0x29   :  { %p477_p4 = pnand %p475_p3, %p472_p2 }
  0x2b   :  { %480 = shalt.err (!%p477_p4)
}
  0x2c   :  { %s481_s29 = scalar_lea.vmem %s45_s20, 1024  ;;  %p486_p6 = scmp.lt.s32.totalorder %s45_s20, %s45_s20 }
  0x2d   :  { %p482_p5 = scmp.ne.s32.totalorder %s45_s20, %s481_s29  ;;  %p487_p7 = scmp.lt.s32.totalorder %s481_s29, %s481_s29 }
  0x2f   :  { %p488_p8 = por %p487_p7, %p486_p6 }
  0x31   :  { %p489_p9 = pnand %p488_p8, %p482_p5 }
  0x33   :  { %492 = shalt.err (!%p489_p9)
}
  0x34   :  { %50 = dma.hbm_to_vmem [thread:$0]  %s662_s3, 1024, %s45_s20, [#allocation7], %s523_s30, %s523_s30, %s524_s6  }
  0x35   :  { %515 = dma.done.wait [#allocation4], 1024  }
  0x36   :  { %516 = vsyncadd [#allocation4], 4294966272 }
  0x37   :  { %517 = dma.done.wait [#allocation7], 1536  }
  0x38   :  { %518 = vsyncadd [#allocation7], 4294965760  ;;  %vm66_vm0 = vcmask 261120   ;;  %v526_v0 = vmov 0.0|0.0   ;;  %v527_v1 = vmov 0.0   ;;  %vm528_vm1 = vmmov 0  }
  0x39   :  { %398 = vmatprep.subr.bf16.mxu0 %v526_v0  ;;  %410 = vmatprep.subr.bf16.mxu1 %v526_v0  ;;  %67 = vst.msk [vmem:[#allocation2] sm:$0xff] %vm66_vm0, %v527_v1  ;;  %v169_v2 = vld [vmem:[#allocation8] sm:$0xff]  ;;  %v170_v3 = vld [vmem:[#allocation8 + $0x8] sm:$0xff]  ;;  %v171_v4 = vld [vmem:[#allocation8 + $0x10] sm:$0xff]  ;;  %vm142_vm2 = vcmask 1041409   ;;  %vm177_vm3 = vcmask 523264  }
  0x3a   :  { %384 = vmatprep.mubr.msk.f32.mxu0 %vm528_vm1, %v527_v1  ;;  %395 = vmatprep.mubr.msk.f32.mxu1 %vm528_vm1, %v527_v1  ;;  %v399_v5 = vpack.c.bf16 %v170_v3, %v169_v2  ;;  %v172_v6 = vld [vmem:[#allocation8 + $0x18] sm:$0xff]  ;;  %v173_v7 = vld [vmem:[#allocation8 + $0x20] sm:$0xff]  ;;  %v174_v8 = vld [vmem:[#allocation8 + $0x28] sm:$0xff]  ;;  %vm144_vm4 = vcmask 1042434   ;;  %vm146_vm5 = vcmask 1043459   ;;  %vm148_vm6 = vcmask 1044484  }
  0x3b   :  { %v164_v9 = vld [vmem:[#allocation6] sm:$0xff]  ;;  %v165_v10 = vld [vmem:[#allocation6 + $0x8] sm:$0xff]  ;;  %v618_v11 = vld [vmem:[#allocation8 + $0x30] sm:$0xff]  ;;  %v402_v12 = vpack.c.bf16 %v172_v6, %v171_v4  ;;  %v405_v17 = vpack.c.bf16 %v174_v8, %v173_v7  ;;  %vm150_vm7 = vcmask 1045509   ;;  %vm152_vm8 = vcmask 1046534  }
  0x3c   :  { %400 = vmatpush3.bf16.msra.mxu0 %v399_v5  ;;  %v411_v13 = vpack.c.bf16 %v165_v10, %v164_v9  ;;  %v620_v14 = vld [vmem:[#allocation8 + $0x38] sm:$0xff]  ;;  %v166_v15 = vld [vmem:[#allocation6 + $0x10] sm:$0xff]  ;;  %v68_v18 = vld [vmem:[#allocation3] sm:$0xff]  ;;  %vm154_vm9 = vcmask 1047559  }
  0x3d   :  { %v167_v16 = vld [vmem:[#allocation6 + $0x18] sm:$0xff]  ;;  %401 = vmatprep.subr.bf16.mxu0 %v526_v0  ;;  %v69_v19 = vld [vmem:[#allocation3 + $0x8] sm:$0xff]  ;;  %v70_v20 = vld [vmem:[#allocation3 + $0x10] sm:$0xff]  ;;  %v78_v25 = vsel %vm66_vm0, %v68_v18, 0.0  ;;  %v408_v28 = vpack.c.bf16 %v620_v14, %v618_v11 }
  0x3e   :  { %412 = vmatpush3.bf16.msra.mxu1 %v411_v13  ;;  %v414_v21 = vpack.c.bf16 %v167_v16, %v166_v15  ;;  %v71_v22 = vld [vmem:[#allocation3 + $0x18] sm:$0xff]  ;;  %v72_v23 = vld [vmem:[#allocation3 + $0x20] sm:$0xff]  ;;  %v73_v24 = vld [vmem:[#allocation3 + $0x28] sm:$0xff]  ;;  %v85_v26 = vsel %vm66_vm0, %v69_v19, 0.0  ;;  %v92_v27 = vsel %vm66_vm0, %v70_v20, 0.0  ;;  %v79_v31 = vrot.slane %v78_v25, 4 }
  0x3f   :  { %413 = vmatprep.subr.bf16.mxu1 %v526_v0  ;;  %v74_v29 = vld [vmem:[#allocation3 + $0x30] sm:$0xff]  ;;  %v75_v30 = vld [vmem:[#allocation3 + $0x38] sm:$0xff]  ;;  %v86_v32 = vrot.slane %v85_v26, 4  ;;  %v93_v33 = vrot.slane %v92_v27, 4  ;;  %v99_v34 = vsel %vm66_vm0, %v71_v22, 0.0  ;;  %v106_v35 = vsel %vm66_vm0, %v72_v23, 0.0 }
  0x40   :  { %403 = vmatpush3.bf16.msra.mxu0 %v402_v12  ;;  %v113_v36 = vsel %vm66_vm0, %v73_v24, 0.0  ;;  %v120_v37 = vsel %vm66_vm0, %v74_v29, 0.0  ;;  %v80_v38 = vadd.f32 %v79_v31, %v78_v25  ;;  %v100_v41 = vrot.slane %v99_v34, 4  ;;  %v76_v25 = vld [vmem:[#allocation2] sm:$0xff] }
  0x41   :  { %404 = vmatprep.subr.bf16.mxu0 %v526_v0  ;;  %v87_v39 = vadd.f32 %v86_v32, %v85_v26  ;;  %v94_v40 = vadd.f32 %v93_v33, %v92_v27  ;;  %v107_v42 = vrot.slane %v106_v35, 4  ;;  %v114_v43 = vrot.slane %v113_v36, 4 }
  0x42   :  { %415 = vmatpush3.bf16.msra.mxu1 %v414_v21  ;;  %v121_v44 = vrot.slane %v120_v37, 4  ;;  %v127_v45 = vsel %vm66_vm0, %v75_v30, 0.0  ;;  %v81_v46 = vrot.slane %v80_v38, 2  ;;  %v101_v49 = vadd.f32 %v100_v41, %v99_v34 }
  0x43   :  { %v88_v47 = vrot.slane %v87_v39, 2  ;;  %v95_v48 = vrot.slane %v94_v40, 2  ;;  %v108_v50 = vadd.f32 %v107_v42, %v106_v35  ;;  %v115_v51 = vadd.f32 %v114_v43, %v113_v36  ;;  %v353_v35 = vld [vmem:[%s663_s4] ss:$0 sm:$0xff] }
  0x44   :  { %406 = vmatpush3.bf16.msra.mxu0 %v405_v17  ;;  %v122_v52 = vadd.f32 %v121_v44, %v120_v37  ;;  %v128_v53 = vrot.slane %v127_v45, 4  ;;  %v82_v54 = vadd.f32 %v81_v46, %v80_v38  ;;  %v102_v57 = vrot.slane %v101_v49, 2 }
  0x45   :  { %407 = vmatprep.subr.bf16.mxu0 %v526_v0  ;;  %v89_v55 = vadd.f32 %v88_v47, %v87_v39  ;;  %v96_v56 = vadd.f32 %v95_v48, %v94_v40  ;;  %v109_v58 = vrot.slane %v108_v50, 2  ;;  %v116_v59 = vrot.slane %v115_v51, 2  ;;  %v168_v0 = vld [vmem:[%s660_s1] sm:$0xff] }
  0x46   :  { %v123_v60 = vrot.slane %v122_v52, 2  ;;  %v129_v61 = vadd.f32 %v128_v53, %v127_v45  ;;  %v83_v62 = vrot.slane %v82_v54, 1  ;;  %v103_v2 = vadd.f32 %v102_v57, %v101_v49 }
  0x47   :  { %v90_v63 = vrot.slane %v89_v55, 1  ;;  %v97_v1 = vrot.slane %v96_v56, 1  ;;  %v110_v3 = vadd.f32 %v109_v58, %v108_v50  ;;  %v117_v4 = vadd.f32 %v116_v59, %v115_v51 }
  0x48   :  { %409 = vmatpush3.bf16.msra.mxu0 %v408_v28  ;;  %v124_v5 = vadd.f32 %v123_v60, %v122_v52  ;;  %v130_v6 = vrot.slane %v129_v61, 2  ;;  %v84_v7 = vadd.f32 %v83_v62, %v82_v54  ;;  %v104_v10 = vrot.slane %v103_v2, 1 }
  0x49   :  { %v91_v8 = vadd.f32 %v90_v63, %v89_v55  ;;  %v98_v9 = vadd.f32 %v97_v1, %v96_v56  ;;  %v111_v11 = vrot.slane %v110_v3, 1  ;;  %v118_v12 = vrot.slane %v117_v4, 1 }
  0x4a   :  { %v125_v13 = vrot.slane %v124_v5, 1  ;;  %v131_v14 = vadd.f32 %v130_v6, %v129_v61  ;;  %v105_v15 = vadd.f32 %v104_v10, %v103_v2 }
  0x4b   :  { %v143_v16 = vsel %vm142_vm2, %v91_v8, %v84_v7  ;;  %385 = vmatmul.mubr.msk.f32.vlgmr.msra.gmra.mrb[0].mxu0 %vm177_vm3, %v168_v0  ;;  %v112_v17 = vadd.f32 %v111_v11, %v110_v3  ;;  %v119_v18 = vadd.f32 %v118_v12, %v117_v4 }
  0x4c   :  { %v132_v19 = vrot.slane %v131_v14, 1  ;;  %v126_v20 = vadd.f32 %v125_v13, %v124_v5  ;;  %v145_v21 = vsel %vm144_vm4, %v98_v9, %v143_v16 }
  0x4d   :  { %v147_v23 = vsel %vm146_vm5, %v105_v15, %v145_v21 }
  0x4e   :  { %v133_v22 = vadd.f32 %v132_v19, %v131_v14  ;;  %v149_v24 = vsel %vm148_vm6, %v112_v17, %v147_v23 }
  0x4f   :  { %v151_v26 = vsel %vm150_vm7, %v119_v18, %v149_v24 }
  0x50   :  { %v153_v27 = vsel %vm152_vm8, %v126_v20, %v151_v26 }
  0x51   :  { %v155_v28 = vsel %vm154_vm9, %v133_v22, %v153_v27 }
  0x52   :  { %v157_v29 = vadd.f32 %v155_v28, %v76_v25 }
  0x54   :  { %158 = vst.msk [vmem:[#allocation2] sm:$0xff] %vm66_vm0, %v157_v29 }
  0x5b   :  { %v162_v30 = vld [vmem:[#allocation2] sm:$0xff] }
  0x5c   :  { %v163_v31 = vmul.f32 0.125, %v162_v30 }
  0x5e   :  { %396 = vmatmul.mubr.msk.f32.vlgmr.msra.gmra.mrb[0].mxu1 %vm66_vm0, %v163_v31 }
 0x11e   :  { %v247_v32 = vpop.f32.mrb[0].mxu0 }
 0x11f   :  { %v386_v33 = vpop.f32.mrb[1].mxu0 }
 0x131   :  { %v320_v34 = vpop.f32.mrb[0].mxu1 }
 0x132   :  { %v321_v36 = vadd.f32 %v320_v34, %v247_v32  ;;  %v397_v37 = vpop.f32.mrb[1].mxu1 }
 0x134   :  { %v331_v38 = vadd.f32 %v353_v35, %v321_v36 }
 0x136   :  { %332 = vst [vmem:[#allocation9] sm:$0xff] %v331_v38 }
 0x137   :  { %337 = vsyncadd [#allocation5], 96  ;;  %s529_s7 = smov [#allocation9]  }
 0x138   :  { %s338_s8 = sshll.u32 %s529_s7, 4  ;;  %s339_s8 = int_to_ptr.vmem [resolvable:$true] %s338_s8 }
 0x139   :  { %s493_s9 = scalar_lea.vmem %s339_s8, 32  ;;  %s497_s10 = scalar_lea.vmem %s339_s8, 128 }
 0x13a   :  { %p494_p10 = scmp.ne.s32.totalorder %s339_s8, %s493_s9  ;;  %p498_p11 = scmp.lt.s32.totalorder %s339_s8, %s339_s8 }
 0x13b   :  { %p499_p12 = scmp.lt.s32.totalorder %s497_s10, %s493_s9 }
 0x13d   :  { %p500_p13 = por %p499_p12, %p498_p11 }
 0x13f   :  { %p501_p0 = pnand %p500_p13, %p494_p10 }
 0x141   :  { %504 = shalt.err (!%p501_p0)
}
 0x142   :  { %s505_s4 = scalar_lea.hbm %s664_s5, 32 }
 0x143   :  { %p506_p1 = scmp.ne.s32.totalorder %s664_s5, %s505_s4  ;;  %p509_p2 = scmp.lt.u32.totalorder %s505_s4, %s664_s5 }
 0x145   :  { %p511_p3 = pnand %p509_p2, %p506_p1 }
 0x147   :  { %514 = shalt.err (!%p511_p3)
}
 0x148   :  { %s530_s2 = smov 32   ;;  %s531_s17 = smov 2  }
 0x149   :  { %344 = dma.vmem_to_hbm [thread:$0]  %s339_s8, 32, %s664_s5, [#allocation5], %s530_s2, %s530_s2, %s531_s17  }
 0x14a   :  { %519 = dma.done.wait [#allocation5], 128  }
 0x14b   :  { %520 = vsyncadd [#allocation5], 4294967168 }
 0x14c   :  { %348 = vsyncpa [#allocation4], 1 }
 0x14d   :  { %349 = vsyncpa [#allocation7], 1 }
 0x14e   :  { %350 = vsyncpa [#allocation5], 1 }

</bundles_post_ra>
